<compile_context>
chip_gen: v7x
topology: tpu7x:2x2x1
jax: 0.10.0
libtpu: 0.0.40
codegen_flags: <defaults>
</compile_context>

<pallas_src>
import jax
import jax.numpy as jnp
from jax.experimental import pallas as pl
from jax.experimental.pallas import tpu as pltpu

LANE = 128  # TPU lane width; the internal hidden dim is padded to this.


# ----------------------------- Pallas kernel --------------------------------
def _ae_fused_kernel(
    x_ref,
    w1_ref, b1_ref,   # encoder fc1: (D,  Hp), (1, Hp)
    w2_ref, b2_ref,   # encoder fc2: (Hp, L ), (1, L )
    w3_ref, b3_ref,   # decoder fc1: (L,  Hp), (1, Hp)
    w4_ref, b4_ref,   # decoder fc2: (Hp, D ), (1, D )
    recon_ref, mu_ref,
):
    """Whole encoder+decoder on one batch tile; intermediates stay on-chip."""
    # Matmul operands take the weight dtype (f32 or bf16); accumulation,
    # bias add and nonlinearities stay in f32.
    x = x_ref[...].astype(w1_ref.dtype)

    # ---- encoder ----
    h = jnp.dot(x, w1_ref[...], preferred_element_type=jnp.float32) + b1_ref[...]
    h = jnp.maximum(h, 0.0)
    mu = (jnp.dot(h.astype(w2_ref.dtype), w2_ref[...],
                  preferred_element_type=jnp.float32) + b2_ref[...])

    # ---- decoder ----
    h2 = (jnp.dot(mu.astype(w3_ref.dtype), w3_ref[...],
                  preferred_element_type=jnp.float32) + b3_ref[...])
    h2 = jnp.maximum(h2, 0.0)
    logits = (jnp.dot(h2.astype(w4_ref.dtype), w4_ref[...],
                      preferred_element_type=jnp.float32) + b4_ref[...])
    # sigmoid(x) == 0.5 * (tanh(0.5 x) + 1): single EUP transcendental.
    recon = 0.5 * (jnp.tanh(0.5 * logits) + 1.0)

    recon_ref[...] = recon.astype(recon_ref.dtype)
    mu_ref[...] = mu.astype(mu_ref.dtype)


# ------------------------------ helpers --------------------------------------
def _round_up(n, m):
    return ((n + m - 1) // m) * m


def _pad_to(a, shape):
    return jnp.pad(a, [(0, s - d) for d, s in zip(a.shape, shape)])


def prepare_params(params, use_bf16=False):
    """One-time parameter prep: pad only the internal hidden dim to a lane
    multiple, reshape biases to (1, n), optionally cast weights to bf16.
    Zero padding of H is exact through ReLU/Linear."""
    D, H = params["enc_fc1_w"].shape
    L = params["enc_fc2_w"].shape[1]
    Hp = _round_up(H, LANE)
    wdt = jnp.bfloat16 if use_bf16 else params["enc_fc1_w"].dtype

    def padw(w, shape):
        return _pad_to(w, shape).astype(wdt)

    def padb(b, n):
        return _pad_to(b, (n,)).reshape(1, n).astype(jnp.float32)

    return {
        "w1": padw(params["enc_fc1_w"], (D, Hp)), "b1": padb(params["enc_fc1_b"], Hp),
        "w2": padw(params["enc_fc2_w"], (Hp, L)), "b2": padb(params["enc_fc2_b"], L),
        "w3": padw(params["dec_fc1_w"], (L, Hp)), "b3": padb(params["dec_fc1_b"], Hp),
        "w4": padw(params["dec_fc2_w"], (Hp, D)), "b4": padb(params["dec_fc2_b"], D),
    }


def _pick_batch_tile(B):
    """>=2 tiles for mid/large batches (v7x megacore); TB<=256 keeps v5e happy."""
    if B >= 1024:
        return 256
    if B >= 128:
        return 128
    return max(8, _round_up(B, 8))


# ------------------------------ forward --------------------------------------
@jax.jit
def ae_forward(prepped, x):
    """Matches AE.forward: mu = encoder(x); recon = decoder(mu); return (recon, mu)."""
    B, D = x.shape
    Hp = prepped["w1"].shape[1]
    L = prepped["w2"].shape[1]
    assert prepped["w1"].shape[0] == D

    TB = _pick_batch_tile(B)
    Bp = _round_up(B, TB)

    # Pad the batch axis only when needed (static Python check).
    xp = x if Bp == B else jnp.pad(x, ((0, Bp - B), (0, 0)))

    batch_map = lambda i: (i, 0)
    const_map = lambda i: (0, 0)  # weights/biases stay VMEM-resident across tiles

    def w_spec(shape):
        # Constant index_map => single-buffer; double-buffering would just
        # double the resident-weight VMEM footprint for zero benefit.
        return pl.BlockSpec(shape, const_map, pipeline_mode=pl.Buffered(1))

    # Explicit scoped-VMEM budget: single-buffered weights + double-buffered
    # activation/output tiles + f32 intermediates, with headroom.
    itemsize = x.dtype.itemsize
    w_bytes = sum(int(v.size) * v.dtype.itemsize for v in prepped.values())
    x_bytes = 2 * TB * D * itemsize
    o_bytes = 2 * TB * (D + L) * itemsize
    i_bytes = 4 * TB * (2 * Hp + L + D)
    need = w_bytes + x_bytes + o_bytes + i_bytes
    vmem_limit = int(min(max(2 * need + (4 << 20), 32 << 20), 64 << 20))

    recon_p, mu_p = pl.pallas_call(
        _ae_fused_kernel,
        out_shape=(
            jax.ShapeDtypeStruct((Bp, D), x.dtype),
            jax.ShapeDtypeStruct((Bp, L), x.dtype),
        ),
        grid=(Bp // TB,),
        in_specs=[
            pl.BlockSpec((TB, D), batch_map),  # x tile (streamed, double-buffered)
            w_spec((D, Hp)),  w_spec((1, Hp)),  # enc fc1
            w_spec((Hp, L)),  w_spec((1, L)),   # enc fc2
            w_spec((L, Hp)),  w_spec((1, Hp)),  # dec fc1
            w_spec((Hp, D)),  w_spec((1, D)),   # dec fc2
        ],
        out_specs=(
            pl.BlockSpec((TB, D), batch_map),   # recon tile
            pl.BlockSpec((TB, L), batch_map),   # mu tile
        ),
        compiler_params=pltpu.CompilerParams(
            dimension_semantics=("parallel",),  # batch tiles are independent
            vmem_limit_bytes=vmem_limit,
        ),
    )(xp,
      prepped["w1"], prepped["b1"], prepped["w2"], prepped["b2"],
      prepped["w3"], prepped["b3"], prepped["w4"], prepped["b4"])

    if Bp != B:  # static check; no copy on the common aligned path
        recon_p = recon_p[:B]
        mu_p = mu_p[:B]
    return recon_p, mu_p


# ------------------------------ parameters -----------------------------------
def init_params(key, in_dim, hidden_dim, latent_dim, dtype=jnp.float32):
    """Deterministic synthetic parameter init (matches nn.Linear shapes)."""
    ks = jax.random.split(key, 8)

    def lin_init(kw, kb, fan_in, fan_out):
        bound = 1.0 / jnp.sqrt(fan_in)
        w = jax.random.uniform(kw, (fan_in, fan_out), dtype, -bound, bound)
        b = jax.random.uniform(kb, (fan_out,), dtype, -bound, bound)
        return w, b

    p = {}
    p["enc_fc1_w"], p["enc_fc1_b"] = lin_init(ks[0], ks[1], in_dim, hidden_dim)
    p["enc_fc2_w"], p["enc_fc2_b"] = lin_init(ks[2], ks[3], hidden_dim, latent_dim)
    p["dec_fc1_w"], p["dec_fc1_b"] = lin_init(ks[4], ks[5], latent_dim, hidden_dim)
    p["dec_fc2_w"], p["dec_fc2_b"] = lin_init(ks[6], ks[7], hidden_dim, in_dim)
    return p


# ------------------------------ reference ------------------------------------
def _ae_forward_ref(params, x):
    h = jnp.maximum(x @ params["enc_fc1_w"] + params["enc_fc1_b"], 0.0)
    mu = h @ params["enc_fc2_w"] + params["enc_fc2_b"]
    h2 = jnp.maximum(mu @ params["dec_fc1_w"] + params["dec_fc1_b"], 0.0)
    recon = jax.nn.sigmoid(h2 @ params["dec_fc2_w"] + params["dec_fc2_b"])
    return recon, mu


# ------------------------------- main ----------------------------------------
if __name__ == "__main__":
    B, D, H, L = 8, 64, 32, 16  # batch, input features, hidden, latent

    key = jax.random.PRNGKey(0)
    k_x, k_p = jax.random.split(key)
    x = jax.random.normal(k_x, (B, D), dtype=jnp.float32)
    params = init_params(k_p, D, H, L)

    # One-time (amortized) parameter preparation; keep f32 so the strict
    # tolerance check passes.  Pass use_bf16=True for the fast MXU path.
    prepped = prepare_params(params, use_bf16=False)

    recon, mu = ae_forward(prepped, x)
    jax.block_until_ready((recon, mu))

    assert recon.shape == (B, D) and mu.shape == (B, L)

    recon_ref, mu_ref = _ae_forward_ref(params, x)
    assert jnp.allclose(recon, recon_ref, atol=1e-5, rtol=1e-5)
    assert jnp.allclose(mu, mu_ref, atol=1e-5, rtol=1e-5)

    print("KERNEL_OK")
</pallas_src>

<mosaic_0001>
module attributes {stable_mosaic.version = 11 : i64} {
  func.func @_ae_fused_kernel(%arg0: i32, %arg1: memref<8x64xf32, #tpu.memory_space<vmem>>, %arg2: memref<64x128xf32, #tpu.memory_space<vmem>>, %arg3: memref<1x128xf32, #tpu.memory_space<vmem>>, %arg4: memref<128x16xf32, #tpu.memory_space<vmem>>, %arg5: memref<1x16xf32, #tpu.memory_space<vmem>>, %arg6: memref<16x128xf32, #tpu.memory_space<vmem>>, %arg7: memref<1x128xf32, #tpu.memory_space<vmem>>, %arg8: memref<128x64xf32, #tpu.memory_space<vmem>>, %arg9: memref<1x64xf32, #tpu.memory_space<vmem>>, %arg10: memref<8x64xf32, #tpu.memory_space<vmem>>, %arg11: memref<8x16xf32, #tpu.memory_space<vmem>>) attributes {dimension_semantics = [#tpu.dimension_semantics<parallel>], iteration_bounds = array<i64: 1>, scalar_prefetch = 0 : i64, scratch_operands = 0 : i64, tpu.core_type = #tpu.core_type<tc>, window_params = [{transform_indices = @transform_0, window_bounds = array<i64: 8, 64>}, {pipeline_mode = #tpu.pipeline_mode<synchronous>, transform_indices = @transform_1, window_bounds = array<i64: 64, 128>}, {pipeline_mode = #tpu.pipeline_mode<synchronous>, transform_indices = @transform_2, window_bounds = array<i64: 1, 128>}, {pipeline_mode = #tpu.pipeline_mode<synchronous>, transform_indices = @transform_3, window_bounds = array<i64: 128, 16>}, {pipeline_mode = #tpu.pipeline_mode<synchronous>, transform_indices = @transform_4, window_bounds = array<i64: 1, 16>}, {pipeline_mode = #tpu.pipeline_mode<synchronous>, transform_indices = @transform_5, window_bounds = array<i64: 16, 128>}, {pipeline_mode = #tpu.pipeline_mode<synchronous>, transform_indices = @transform_6, window_bounds = array<i64: 1, 128>}, {pipeline_mode = #tpu.pipeline_mode<synchronous>, transform_indices = @transform_7, window_bounds = array<i64: 128, 64>}, {pipeline_mode = #tpu.pipeline_mode<synchronous>, transform_indices = @transform_8, window_bounds = array<i64: 1, 64>}, {transform_indices = @transform_9, window_bounds = array<i64: 8, 64>}, {transform_indices = @transform_10, window_bounds = array<i64: 8, 16>}]} {
    %c0 = arith.constant 0 : index
    %c0_0 = arith.constant 0 : index
    %0 = vector.load %arg1[%c0, %c0_0] : memref<8x64xf32, #tpu.memory_space<vmem>>, vector<8x64xf32>
    %c0_1 = arith.constant 0 : index
    %c0_2 = arith.constant 0 : index
    %1 = vector.load %arg2[%c0_1, %c0_2] : memref<64x128xf32, #tpu.memory_space<vmem>>, vector<64x128xf32>
    %cst = arith.constant dense<0.000000e+00> : vector<8x128xf32>
    %2 = tpu.matmul %0, %1, %cst {dimension_numbers = #tpu.dot_dimension_numbers<[1], [0], [0], [1], [0, 0, 1, 1], [], []>} : vector<8x64xf32>, vector<64x128xf32>, vector<8x128xf32> -> vector<8x128xf32>
    %c0_3 = arith.constant 0 : index
    %c0_4 = arith.constant 0 : index
    %3 = vector.load %arg3[%c0_3, %c0_4] : memref<1x128xf32, #tpu.memory_space<vmem>>, vector<1x128xf32>
    %4 = vector.broadcast %3 : vector<1x128xf32> to vector<8x128xf32>
    %5 = arith.addf %2, %4 : vector<8x128xf32>
    %cst_5 = arith.constant 0.000000e+00 : f32
    %6 = vector.broadcast %cst_5 : f32 to vector<8x128xf32>
    %7 = arith.maximumf %5, %6 : vector<8x128xf32>
    %c0_6 = arith.constant 0 : index
    %c0_7 = arith.constant 0 : index
    %8 = vector.load %arg4[%c0_6, %c0_7] : memref<128x16xf32, #tpu.memory_space<vmem>>, vector<128x16xf32>
    %cst_8 = arith.constant dense<0.000000e+00> : vector<8x16xf32>
    %9 = tpu.matmul %7, %8, %cst_8 {dimension_numbers = #tpu.dot_dimension_numbers<[1], [0], [0], [1], [0, 0, 1, 1], [], []>} : vector<8x128xf32>, vector<128x16xf32>, vector<8x16xf32> -> vector<8x16xf32>
    %c0_9 = arith.constant 0 : index
    %c0_10 = arith.constant 0 : index
    %10 = vector.load %arg5[%c0_9, %c0_10] : memref<1x16xf32, #tpu.memory_space<vmem>>, vector<1x16xf32>
    %11 = vector.broadcast %10 : vector<1x16xf32> to vector<8x16xf32>
    %12 = arith.addf %9, %11 : vector<8x16xf32>
    %c0_11 = arith.constant 0 : index
    %c0_12 = arith.constant 0 : index
    %13 = vector.load %arg6[%c0_11, %c0_12] : memref<16x128xf32, #tpu.memory_space<vmem>>, vector<16x128xf32>
    %cst_13 = arith.constant dense<0.000000e+00> : vector<8x128xf32>
    %14 = tpu.matmul %12, %13, %cst_13 {dimension_numbers = #tpu.dot_dimension_numbers<[1], [0], [0], [1], [0, 0, 1, 1], [], []>} : vector<8x16xf32>, vector<16x128xf32>, vector<8x128xf32> -> vector<8x128xf32>
    %c0_14 = arith.constant 0 : index
    %c0_15 = arith.constant 0 : index
    %15 = vector.load %arg7[%c0_14, %c0_15] : memref<1x128xf32, #tpu.memory_space<vmem>>, vector<1x128xf32>
    %16 = vector.broadcast %15 : vector<1x128xf32> to vector<8x128xf32>
    %17 = arith.addf %14, %16 : vector<8x128xf32>
    %cst_16 = arith.constant 0.000000e+00 : f32
    %18 = vector.broadcast %cst_16 : f32 to vector<8x128xf32>
    %19 = arith.maximumf %17, %18 : vector<8x128xf32>
    %c0_17 = arith.constant 0 : index
    %c0_18 = arith.constant 0 : index
    %20 = vector.load %arg8[%c0_17, %c0_18] : memref<128x64xf32, #tpu.memory_space<vmem>>, vector<128x64xf32>
    %cst_19 = arith.constant dense<0.000000e+00> : vector<8x64xf32>
    %21 = tpu.matmul %19, %20, %cst_19 {dimension_numbers = #tpu.dot_dimension_numbers<[1], [0], [0], [1], [0, 0, 1, 1], [], []>} : vector<8x128xf32>, vector<128x64xf32>, vector<8x64xf32> -> vector<8x64xf32>
    %c0_20 = arith.constant 0 : index
    %c0_21 = arith.constant 0 : index
    %22 = vector.load %arg9[%c0_20, %c0_21] : memref<1x64xf32, #tpu.memory_space<vmem>>, vector<1x64xf32>
    %23 = vector.broadcast %22 : vector<1x64xf32> to vector<8x64xf32>
    %24 = arith.addf %21, %23 : vector<8x64xf32>
    %cst_22 = arith.constant 5.000000e-01 : f32
    %25 = vector.broadcast %cst_22 : f32 to vector<8x64xf32>
    %26 = arith.mulf %25, %24 : vector<8x64xf32>
    %27 = math.tanh %26 : vector<8x64xf32>
    %cst_23 = arith.constant 1.000000e+00 : f32
    %28 = vector.broadcast %cst_23 : f32 to vector<8x64xf32>
    %29 = arith.addf %27, %28 : vector<8x64xf32>
    %cst_24 = arith.constant 5.000000e-01 : f32
    %30 = vector.broadcast %cst_24 : f32 to vector<8x64xf32>
    %31 = arith.mulf %30, %29 : vector<8x64xf32>
    %c0_25 = arith.constant 0 : index
    %c0_26 = arith.constant 0 : index
    %32 = vector.load %arg10[%c0_25, %c0_26] : memref<8x64xf32, #tpu.memory_space<vmem>>, vector<8x64xf32>
    tpu.vector_store %arg10[%c0_25, %c0_26], %31 {strides = array<i32>} : memref<8x64xf32, #tpu.memory_space<vmem>>, vector<8x64xf32>,
    %c0_27 = arith.constant 0 : index
    %c0_28 = arith.constant 0 : index
    %33 = vector.load %arg11[%c0_27, %c0_28] : memref<8x16xf32, #tpu.memory_space<vmem>>, vector<8x16xf32>
    tpu.vector_store %arg11[%c0_27, %c0_28], %12 {strides = array<i32>} : memref<8x16xf32, #tpu.memory_space<vmem>>, vector<8x16xf32>,
    return
  }
  func.func @transform_0(%arg0: i32) -> (i32, i32) {
    %c0_i32 = arith.constant 0 : i32
    %c0_i32_0 = arith.constant 0 : i32
    return %arg0, %c0_i32 : i32, i32
  }
  func.func @transform_1(%arg0: i32) -> (i32, i32) {
    %c0_i32 = arith.constant 0 : i32
    %c0_i32_0 = arith.constant 0 : i32
    %c0_i32_1 = arith.constant 0 : i32
    return %c0_i32, %c0_i32_0 : i32, i32
  }
  func.func @transform_2(%arg0: i32) -> (i32, i32) {
    %c0_i32 = arith.constant 0 : i32
    %c0_i32_0 = arith.constant 0 : i32
    %c0_i32_1 = arith.constant 0 : i32
    return %c0_i32, %c0_i32_0 : i32, i32
  }
  func.func @transform_3(%arg0: i32) -> (i32, i32) {
    %c0_i32 = arith.constant 0 : i32
    %c0_i32_0 = arith.constant 0 : i32
    %c0_i32_1 = arith.constant 0 : i32
    return %c0_i32, %c0_i32_0 : i32, i32
  }
  func.func @transform_4(%arg0: i32) -> (i32, i32) {
    %c0_i32 = arith.constant 0 : i32
    %c0_i32_0 = arith.constant 0 : i32
    %c0_i32_1 = arith.constant 0 : i32
    return %c0_i32, %c0_i32_0 : i32, i32
  }
  func.func @transform_5(%arg0: i32) -> (i32, i32) {
    %c0_i32 = arith.constant 0 : i32
    %c0_i32_0 = arith.constant 0 : i32
    %c0_i32_1 = arith.constant 0 : i32
    return %c0_i32, %c0_i32_0 : i32, i32
  }
  func.func @transform_6(%arg0: i32) -> (i32, i32) {
    %c0_i32 = arith.constant 0 : i32
    %c0_i32_0 = arith.constant 0 : i32
    %c0_i32_1 = arith.constant 0 : i32
    return %c0_i32, %c0_i32_0 : i32, i32
  }
  func.func @transform_7(%arg0: i32) -> (i32, i32) {
    %c0_i32 = arith.constant 0 : i32
    %c0_i32_0 = arith.constant 0 : i32
    %c0_i32_1 = arith.constant 0 : i32
    return %c0_i32, %c0_i32_0 : i32, i32
  }
  func.func @transform_8(%arg0: i32) -> (i32, i32) {
    %c0_i32 = arith.constant 0 : i32
    %c0_i32_0 = arith.constant 0 : i32
    %c0_i32_1 = arith.constant 0 : i32
    return %c0_i32, %c0_i32_0 : i32, i32
  }
  func.func @transform_9(%arg0: i32) -> (i32, i32) {
    %c0_i32 = arith.constant 0 : i32
    %c0_i32_0 = arith.constant 0 : i32
    return %arg0, %c0_i32 : i32, i32
  }
  func.func @transform_10(%arg0: i32) -> (i32, i32) {
    %c0_i32 = arith.constant 0 : i32
    %c0_i32_0 = arith.constant 0 : i32
    return %arg0, %c0_i32 : i32, i32
  }
}

</mosaic_0001>

<bundles_post_ra>
// kernel: ae_forward.1
= control target key start
LH: loop header
LB: loop body
LE: loop exit
PB: predicated region body
PF: predicated region fallthrough
CT: control target
= control target key end

     0   :  { %16 = vsyncpa [#allocation3], 0  ;;  %v697_v3 = vmov 0.0|0.0   ;;  %vm698_vm0 = vmmov 0   ;;  %v699_v6 = vmov 0.0   ;;  %s953_s0 = inlined_call_operand.vmem [shape: f32[8,64], index: 0, kind: input, shape index: {}]   ;;  %s954_s1 = inlined_call_operand.vmem [shape: f32[64,128], index: 1, kind: input, shape index: {}]   ;;  %s955_s2 = inlined_call_operand.vmem [shape: f32[1,128], index: 2, kind: input, shape index: {}]   ;;  %s956_s3 = inlined_call_operand.vmem [shape: f32[128,16], index: 3, kind: input, shape index: {}]   ;;  %s957_s4 = inlined_call_operand.vmem [shape: f32[1,16], index: 4, kind: input, shape index: {}]   ;;  %s958_s5 = inlined_call_operand.vmem [shape: f32[16,128], index: 5, kind: input, shape index: {}]   ;;  %s959_s6 = inlined_call_operand.vmem [shape: f32[1,128], index: 6, kind: input, shape index: {}]   ;;  %s960_s7 = inlined_call_operand.vmem [shape: f32[128,64], index: 7, kind: input, shape index: {}]   ;;  %s961_s8 = inlined_call_operand.vmem [shape: f32[1,64], index: 8, kind: input, shape index: {}]   ;;  %s962_s9 = inlined_call_operand.hbm [shape: f32[8,64], index: 9, kind: output, shape index: {0}]   ;;  %s963_s10 = inlined_call_operand.hbm [shape: f32[8,16], index: 10, kind: output, shape index: {1}]  }
   0x1   :  { %v37_v0 = vld [vmem:[%s954_s1] sm:$0xff]  ;;  %v38_v1 = vld [vmem:[%s954_s1 + $0x8] sm:$0xff]  ;;  %v39_v2 = vld [vmem:[%s954_s1 + $0x10] sm:$0xff]  ;;  %579 = vmatprep.subr.bf16.mxu1 %v697_v3  ;;  %499 = vmatprep.mubr.msk.f32.mxu1 %vm698_vm0, %v699_v6 }
   0x2   :  { %v580_v4 = vpack.c.bf16 %v38_v1, %v37_v0  ;;  %v40_v5 = vld [vmem:[%s954_s1 + $0x18] sm:$0xff]  ;;  %615 = vmatprep.subr.bf16.mxu0 %v697_v3  ;;  %541 = vmatprep.mubr.msk.f32.mxu0 %vm698_vm0, %v699_v6  ;;  %v41_v8 = vld [vmem:[%s954_s1 + $0x20] sm:$0xff]  ;;  %v42_v9 = vld [vmem:[%s954_s1 + $0x28] sm:$0xff] }
   0x3   :  { %v583_v7 = vpack.c.bf16 %v40_v5, %v39_v2  ;;  %v586_v10 = vpack.c.bf16 %v42_v9, %v41_v8  ;;  %v43_v11 = vld [vmem:[%s954_s1 + $0x30] sm:$0xff]  ;;  %v44_v12 = vld [vmem:[%s954_s1 + $0x38] sm:$0xff] }
   0x4   :  { %581 = vmatpush3.bf16.msra.mxu1 %v580_v4 }
   0x5   :  { %582 = vmatprep.subr.bf16.mxu1 %v697_v3 }
   0x8   :  { %584 = vmatpush3.bf16.msra.mxu1 %v583_v7 }
   0x9   :  { %585 = vmatprep.subr.bf16.mxu1 %v697_v3 }
   0xa   :  { %17 = vsyncpa [#allocation5], 0  ;;  %v589_v13 = vpack.c.bf16 %v44_v12, %v43_v11  ;;  %v127_v14 = vld [vmem:[%s956_s3] sm:$0xff]  ;;  %v128_v15 = vld [vmem:[%s956_s3 + $0x8] sm:$0xff]  ;;  %vm52_vm1 = vcmask 523264   ;;  %vm229_vm2 = vcmask 130048  }
   0xb   :  { %v36_v16 = vld [vmem:[%s953_s0] sm:$0xff]  ;;  %v592_v17 = vpack.c.bf16 %v128_v15, %v127_v14  ;;  %v129_v18 = vld [vmem:[%s956_s3 + $0x10] sm:$0xff]  ;;  %v130_v19 = vld [vmem:[%s956_s3 + $0x18] sm:$0xff] }
   0xc   :  { %587 = vmatpush3.bf16.msra.mxu1 %v586_v10  ;;  %v595_v20 = vpack.c.bf16 %v130_v19, %v129_v18  ;;  %v131_v21 = vld [vmem:[%s956_s3 + $0x20] sm:$0xff]  ;;  %v132_v22 = vld [vmem:[%s956_s3 + $0x28] sm:$0xff]  ;;  %v133_v24 = vld [vmem:[%s956_s3 + $0x30] sm:$0xff] }
   0xd   :  { %588 = vmatprep.subr.bf16.mxu1 %v697_v3  ;;  %v598_v23 = vpack.c.bf16 %v132_v22, %v131_v21  ;;  %v134_v25 = vld [vmem:[%s956_s3 + $0x38] sm:$0xff]  ;;  %v135_v27 = vld [vmem:[%s956_s3 + $0x40] sm:$0xff]  ;;  %v136_v28 = vld [vmem:[%s956_s3 + $0x48] sm:$0xff] }
   0xe   :  { %v601_v26 = vpack.c.bf16 %v134_v25, %v133_v24  ;;  %v604_v29 = vpack.c.bf16 %v136_v28, %v135_v27  ;;  %v137_v30 = vld [vmem:[%s956_s3 + $0x50] sm:$0xff]  ;;  %v138_v31 = vld [vmem:[%s956_s3 + $0x58] sm:$0xff]  ;;  %v139_v33 = vld [vmem:[%s956_s3 + $0x60] sm:$0xff] }
   0xf   :  { %v607_v32 = vpack.c.bf16 %v138_v31, %v137_v30  ;;  %v140_v34 = vld [vmem:[%s956_s3 + $0x68] sm:$0xff]  ;;  %v141_v36 = vld [vmem:[%s956_s3 + $0x70] sm:$0xff]  ;;  %v142_v37 = vld [vmem:[%s956_s3 + $0x78] sm:$0xff] }
  0x10   :  { %590 = vmatpush3.bf16.msra.mxu1 %v589_v13  ;;  %v610_v35 = vpack.c.bf16 %v140_v34, %v139_v33  ;;  %v613_v38 = vpack.c.bf16 %v142_v37, %v141_v36  ;;  %v431_v39 = vld [vmem:[%s955_s2] ss:$0 sm:$0xff]  ;;  %v221_v45 = vld [vmem:[%s958_s5 + $0x8] sm:$0xff]  ;;  %v306_v54 = vld [vmem:[%s960_s7 + $0x10] sm:$0xff] }
  0x11   :  { %591 = vmatprep.subr.bf16.mxu1 %v697_v3  ;;  %v220_v44 = vld [vmem:[%s958_s5] sm:$0xff]  ;;  %v305_v48 = vld [vmem:[%s960_s7 + $0x8] sm:$0xff]  ;;  %v307_v55 = vld [vmem:[%s960_s7 + $0x18] sm:$0xff] }
  0x12   :  { %v616_v46 = vpack.c.bf16 %v221_v45, %v220_v44  ;;  %v304_v47 = vld [vmem:[%s960_s7] sm:$0xff]  ;;  %v622_v56 = vpack.c.bf16 %v307_v55, %v306_v54  ;;  %v309_v58 = vld [vmem:[%s960_s7 + $0x28] sm:$0xff]  ;;  %v310_v60 = vld [vmem:[%s960_s7 + $0x30] sm:$0xff] }
  0x13   :  { %500 = vmatmul.mubr.msk.f32.vlgmr.msra.gmra.mrb[0].mxu1 %vm52_vm1, %v36_v16  ;;  %v433_v49 = vld [vmem:[%s957_s4] ss:$0 sm:$0xff]  ;;  %v619_v51 = vpack.c.bf16 %v305_v48, %v304_v47  ;;  %v311_v61 = vld [vmem:[%s960_s7 + $0x38] sm:$0xff]  ;;  %v313_v0 = vld [vmem:[%s960_s7 + $0x48] sm:$0xff]  ;;  %s700_s4 = smov [#allocation4]  }
  0x14   :  { %593 = vmatpush3.bf16.msra.mxu1 %v592_v17  ;;  %534 = vmatprep.mubr.msk.f32.mxu1 %vm698_vm0, %v699_v6  ;;  %v308_v57 = vld [vmem:[%s960_s7 + $0x20] sm:$0xff]  ;;  %v628_v62 = vpack.c.bf16 %v311_v61, %v310_v60  ;;  %v314_v2 = vld [vmem:[%s960_s7 + $0x50] sm:$0xff]  ;;  %v315_v4 = vld [vmem:[%s960_s7 + $0x58] sm:$0xff]  ;;  %s419_s12 = sshll.u32 %s700_s4, 4  ;;  %s420_s12 = int_to_ptr.vmem [resolvable:$true] %s419_s12 }
  0x15   :  { %594 = vmatprep.subr.bf16.mxu1 %v697_v3  ;;  %617 = vmatpush3.bf16.msra.mxu0 %v616_v46  ;;  %v625_v59 = vpack.c.bf16 %v309_v58, %v308_v57  ;;  %v312_v63 = vld [vmem:[%s960_s7 + $0x40] sm:$0xff]  ;;  %v634_v5 = vpack.c.bf16 %v315_v4, %v314_v2  ;;  %v317_v7 = vld [vmem:[%s960_s7 + $0x68] sm:$0xff]  ;;  %v318_v9 = vld [vmem:[%s960_s7 + $0x70] sm:$0xff]  ;;  %s649_s13 = scalar_lea.vmem %s420_s12, 128  ;;  %p654_p1 = scmp.lt.s32.totalorder %s420_s12, %s420_s12 }
  0x16   :  { %618 = vmatprep.subr.bf16.mxu0 %v697_v3  ;;  %v631_v1 = vpack.c.bf16 %v313_v0, %v312_v63  ;;  %v319_v10 = vld [vmem:[%s960_s7 + $0x78] sm:$0xff]  ;;  %v434_v12 = vld [vmem:[%s959_s6] ss:$0 sm:$0xff]  ;;  %p650_p0 = scmp.ne.s32.totalorder %s420_s12, %s649_s13  ;;  %p655_p2 = scmp.lt.s32.totalorder %s649_s13, %s649_s13 }
  0x17   :  { %v640_v11 = vpack.c.bf16 %v319_v10, %v318_v9 }
  0x18   :  { %596 = vmatpush3.bf16.msra.mxu1 %v595_v20  ;;  %p656_p3 = por %p655_p2, %p654_p1 }
  0x19   :  { %597 = vmatprep.subr.bf16.mxu1 %v697_v3 }
  0x1a   :  { %p657_p4 = pnand %p656_p3, %p650_p0 }
  0x1c   :  { %599 = vmatpush3.bf16.msra.mxu1 %v598_v23 }
  0x1d   :  { %600 = vmatprep.subr.bf16.mxu1 %v697_v3 }
  0x20   :  { %602 = vmatpush3.bf16.msra.mxu1 %v601_v26 }
  0x21   :  { %603 = vmatprep.subr.bf16.mxu1 %v697_v3 }
  0x24   :  { %605 = vmatpush3.bf16.msra.mxu1 %v604_v29 }
  0x25   :  { %606 = vmatprep.subr.bf16.mxu1 %v697_v3 }
  0x28   :  { %608 = vmatpush3.bf16.msra.mxu1 %v607_v32 }
  0x29   :  { %609 = vmatprep.subr.bf16.mxu1 %v697_v3 }
  0x2c   :  { %611 = vmatpush3.bf16.msra.mxu1 %v610_v35 }
  0x2d   :  { %612 = vmatprep.subr.bf16.mxu1 %v697_v3 }
  0x30   :  { %614 = vmatpush3.bf16.msra.mxu1 %v613_v38 }
  0xe6   :  { %v122_v40 = vpop.f32.mrb[0].mxu1 }
  0xe7   :  { %v123_v41 = vadd.f32 %v431_v39, %v122_v40  ;;  %v501_v42 = vpop.f32.mrb[1].mxu1 }
  0xe9   :  { %v126_v43 = vmax.f32 %v123_v41, 0.0 }
  0xeb   :  { %535 = vmatmul.mubr.f32.vlgmr.msra.gmra.mrb[2].mxu1 %v126_v43 }
 0x1be   :  { %v216_v50 = vpop.f32.mrb[2].mxu1 }
 0x1bf   :  { %v217_v52 = vadd.f32 %v433_v49, %v216_v50  ;;  %v536_v53 = vpop.f32.mrb[3].mxu1 }
 0x1c1   :  { %542 = vmatmul.mubr.msk.f32.vlgmr.msra.gmra.mrb[0].mxu0 %vm229_vm2, %v217_v52  ;;  %402 = vst.msk [vmem:[#allocation4] sm:$0xff] %vm229_vm2, %v217_v52 }
 0x1c2   :  { %620 = vmatpush3.bf16.msra.mxu0 %v619_v51  ;;  %576 = vmatprep.mubr.msk.f32.mxu0 %vm698_vm0, %v699_v6  ;;  %v316_v6 = vld [vmem:[%s960_s7 + $0x60] sm:$0xff] }
 0x1c3   :  { %621 = vmatprep.subr.bf16.mxu0 %v697_v3  ;;  %v637_v8 = vpack.c.bf16 %v317_v7, %v316_v6 }
 0x1c6   :  { %623 = vmatpush3.bf16.msra.mxu0 %v622_v56 }
 0x1c7   :  { %624 = vmatprep.subr.bf16.mxu0 %v697_v3 }
 0x1ca   :  { %626 = vmatpush3.bf16.msra.mxu0 %v625_v59 }
 0x1cb   :  { %627 = vmatprep.subr.bf16.mxu0 %v697_v3 }
 0x1ce   :  { %629 = vmatpush3.bf16.msra.mxu0 %v628_v62 }
 0x1cf   :  { %630 = vmatprep.subr.bf16.mxu0 %v697_v3 }
 0x1d2   :  { %632 = vmatpush3.bf16.msra.mxu0 %v631_v1 }
 0x1d3   :  { %633 = vmatprep.subr.bf16.mxu0 %v697_v3 }
 0x1d6   :  { %635 = vmatpush3.bf16.msra.mxu0 %v634_v5 }
 0x1d7   :  { %636 = vmatprep.subr.bf16.mxu0 %v697_v3 }
 0x1da   :  { %638 = vmatpush3.bf16.msra.mxu0 %v637_v8 }
 0x1db   :  { %639 = vmatprep.subr.bf16.mxu0 %v697_v3 }
 0x1de   :  { %641 = vmatpush3.bf16.msra.mxu0 %v640_v11 }
 0x294   :  { %v299_v13 = vpop.f32.mrb[0].mxu0 }
 0x295   :  { %v300_v14 = vadd.f32 %v434_v12, %v299_v13  ;;  %v543_v15 = vpop.f32.mrb[1].mxu0 }
 0x297   :  { %v303_v16 = vmax.f32 %v300_v14, 0.0 }
 0x299   :  { %577 = vmatmul.mubr.f32.vlgmr.msra.gmra.mrb[2].mxu0 %v303_v16 }
 0x29a   :  { %660 = shalt.err (!%p657_p4)
}
 0x29b   :  { %s661_s1 = scalar_lea.hbm %s963_s10, 128 }
 0x29c   :  { %p662_p5 = scmp.ne.s32.totalorder %s963_s10, %s661_s1  ;;  %p665_p6 = scmp.lt.u32.totalorder %s661_s1, %s963_s10 }
 0x29e   :  { %p667_p7 = pnand %p665_p6, %p662_p5 }
 0x2a0   :  { %670 = shalt.err (!%p667_p7)
}
 0x2a1   :  { %422 = dma.vmem_to_hbm [thread:$0]  %s420_s12, 128, %s963_s10, [#allocation5]   ;;  %v436_v3 = vld [vmem:[%s961_s8] ss:$0 sm:$0xff] }
 0x2a2   :  { %s701_s21 = smov [#allocation2]  }
 0x2a3   :  { %s409_s22 = sshll.u32 %s701_s21, 4  ;;  %s410_s22 = int_to_ptr.vmem [resolvable:$true] %s409_s22 }
 0x2a4   :  { %s671_s23 = scalar_lea.vmem %s410_s22, 128  ;;  %p676_p9 = scmp.lt.s32.totalorder %s410_s22, %s410_s22 }
 0x2a5   :  { %p672_p8 = scmp.ne.s32.totalorder %s410_s22, %s671_s23  ;;  %p677_p10 = scmp.lt.s32.totalorder %s671_s23, %s671_s23 }
 0x2a7   :  { %p678_p11 = por %p677_p10, %p676_p9 }
 0x2a9   :  { %p679_p12 = pnand %p678_p11, %p672_p8 }
 0x36c   :  { %v393_v17 = vpop.f32.mrb[2].mxu0 }
 0x36d   :  { %v394_v18 = vadd.f32 %v436_v3, %v393_v17  ;;  %v578_v19 = vpop.f32.mrb[3].mxu0 }
 0x36f   :  { %v397_v20 = vmul.f32 0.5, %v394_v18 }
 0x371   :  { %647 = vtanh.f32 %v397_v20 }
 0x37b   :  { %v648_v21 = vpop.eup %647 }
 0x37c   :  { %v399_v22 = vadd.f32 1.0, %v648_v21 }
 0x37e   :  { %v400_v23 = vmul.f32 0.5, %v399_v22 }
 0x380   :  { %401 = vst.msk [vmem:[#allocation2] sm:$0xff] %vm52_vm1, %v400_v23 }
 0x381   :  { %682 = shalt.err (!%p679_p12)
}
 0x382   :  { %s683_s24 = scalar_lea.hbm %s962_s9, 128 }
 0x383   :  { %p684_p13 = scmp.ne.s32.totalorder %s962_s9, %s683_s24  ;;  %p687_p0 = scmp.lt.u32.totalorder %s683_s24, %s962_s9 }
 0x385   :  { %p689_p1 = pnand %p687_p0, %p684_p13 }
 0x387   :  { %692 = shalt.err (!%p689_p1)
}
 0x388   :  { %412 = dma.vmem_to_hbm [thread:$0]  %s410_s22, 128, %s962_s9, [#allocation3]  }
 0x389   :  { %693 = dma.done.wait [#allocation3], 128  }
 0x38a   :  { %694 = vsyncadd [#allocation3], 4294967168 }
 0x38b   :  { %695 = dma.done.wait [#allocation5], 128  }
 0x38c   :  { %696 = vsyncadd [#allocation5], 4294967168 }
 0x38d   :  { %429 = vsyncpa [#allocation3], 1 }
 0x38e   :  { %430 = vsyncpa [#allocation5], 1 }

</bundles_post_ra>
